<compile_context>
chip_gen: v7x
topology: tpu7x:2x2x1
jax: 0.10.0
libtpu: 0.0.40
codegen_flags: <defaults>
</compile_context>

<pallas_src>
import jax
import jax.numpy as jnp
from jax import lax
from jax.experimental import pallas as pl
from jax.experimental.pallas import tpu as pltpu


def qpredictor_kernel(x_ref, w1_ref, b1_ref, w2_ref, b2_ref, w3_ref, b3_ref,
                      out_ref):
    # x_ref: (TB, in_features) -- natural layout, contiguous DMA.  Activations
    # are kept features-major so the batch sits on the 128-wide lane axis.
    x = x_ref[...]

    # Linear(in, 32) + ReLU -> (32, TB): contract dim 1 of w1 with dim 1 of x,
    # producing the lane-dense activation directly (no wrapper transpose).
    h1 = lax.dot_general(w1_ref[...], x, (((1,), (1,)), ((), ())),
                         preferred_element_type=jnp.float32) + b1_ref[...]
    h1 = jnp.maximum(h1, 0.0)

    # Linear(32, 16) + ReLU -> (16, TB)
    h2 = jnp.dot(w2_ref[...], h1, preferred_element_type=jnp.float32) + b2_ref[...]
    h2 = jnp.maximum(h2, 0.0)

    # Linear(16, out) -> (out_features, TB)
    logits = jnp.dot(w3_ref[...], h2,
                     preferred_element_type=jnp.float32) + b3_ref[...]

    # Softmax over the feature axis (torch dim=1 == axis 0 in this layout),
    # numerically stable; the divide goes to the EUP via pl.reciprocal.
    m = jnp.max(logits, axis=0, keepdims=True)
    e = jnp.exp(logits - m)
    s = jnp.sum(e, axis=0, keepdims=True)
    out_ref[...] = e * pl.reciprocal(s, approx=False)


def _round_up(n, m):
    return pl.cdiv(n, m) * m


def qpredictor_forward(x, params, *, block_batch=16384, transpose_output=True):
    """x: (batch, in_features) float32.

    transpose_output=True  -> (batch, out_features) softmax probs (torch layout).
    transpose_output=False -> (out_features, batch) lane-major layout (skips the
                              final small transpose copy for fused consumers).
    """
    w1, b1, w2, b2, w3, b3 = params
    batch, in_features = x.shape
    out_features = w3.shape[0]

    lane = 128
    batch_lanes = _round_up(batch, lane)     # lane padding for the output array only
    tb = min(_round_up(block_batch, lane), batch_lanes)
    # v7x: keep >= 2 grid steps whenever there is more than one 128-lane tile of
    # work so the "parallel" batch axis can shard across both TensorCores.
    if batch_lanes > lane and pl.cdiv(batch_lanes, tb) < 2:
        tb = _round_up(pl.cdiv(batch_lanes, 2), lane)

    grid = (pl.cdiv(batch_lanes, tb),)

    def _const(shape):
        return pl.BlockSpec(shape, lambda i: (0, 0))

    out_t = pl.pallas_call(
        qpredictor_kernel,
        out_shape=jax.ShapeDtypeStruct((out_features, batch_lanes), jnp.float32),
        grid=grid,
        in_specs=[
            # x streams in its natural (batch, feat) layout; partial last block
            # is handled by Pallas (OOB rows are garbage, per-column independent).
            pl.BlockSpec((tb, in_features), lambda i: (i, 0)),
            _const(w1.shape), _const(b1.shape),      # weights/biases VMEM-resident
            _const(w2.shape), _const(b2.shape),
            _const(w3.shape), _const(b3.shape),
        ],
        out_specs=pl.BlockSpec((out_features, tb), lambda i: (0, i)),
        compiler_params=pltpu.CompilerParams(
            dimension_semantics=("parallel",)),
    )(x, w1, b1, w2, b2, w3, b3)

    if transpose_output:
        return jnp.transpose(out_t[:, :batch])   # torch-visible (batch, out) layout
    return out_t[:, :batch]                      # lane-major (out, batch) layout


def init_params(key, in_features, out_features=2):
    """torch.nn.Linear-style init: W (fan_out, fan_in), b (fan_out, 1),
    uniform(+/- 1/sqrt(fan_in))."""
    dims = [(in_features, 32), (32, 16), (16, out_features)]
    params = []
    for fan_in, fan_out in dims:
        key, kw, kb = jax.random.split(key, 3)
        bound = 1.0 / jnp.sqrt(jnp.float32(fan_in))
        w = jax.random.uniform(kw, (fan_out, fan_in), jnp.float32, -bound, bound)
        b = jax.random.uniform(kb, (fan_out, 1), jnp.float32, -bound, bound)
        params += [w, b]
    return tuple(params)


def reference_forward(x, params):
    """Pure-JAX reference matching the PyTorch module semantics."""
    w1, b1, w2, b2, w3, b3 = params
    h1 = jnp.maximum(x @ w1.T + b1[:, 0], 0.0)
    h2 = jnp.maximum(h1 @ w2.T + b2[:, 0], 0.0)
    logits = h2 @ w3.T + b3[:, 0]
    return jax.nn.softmax(logits, axis=1)


if __name__ == "__main__":
    in_features = 16
    out_features = 2

    key = jax.random.PRNGKey(0)
    key, kp = jax.random.split(key)
    params = init_params(kp, in_features, out_features)

    # --- small batch (single tile, partial block 8 of 128 lanes) ---
    key, kx = jax.random.split(key)
    x = jax.random.normal(kx, (8, in_features), jnp.float32)
    out = jax.block_until_ready(qpredictor_forward(x, params))
    ref = reference_forward(x, params)
    assert out.shape == (8, out_features)
    assert jnp.allclose(out, ref, atol=1e-5, rtol=1e-5), "mismatch vs reference"
    assert jnp.allclose(jnp.sum(out, axis=1), 1.0, atol=1e-5)

    # --- multi-tile grid + partial last block (batch=200, TB=128 -> grid=(2,)) ---
    key, kx2 = jax.random.split(key)
    x2 = jax.random.normal(kx2, (200, in_features), jnp.float32)
    out2 = jax.block_until_ready(qpredictor_forward(x2, params, block_batch=128))
    ref2 = reference_forward(x2, params)
    assert out2.shape == (200, out_features)
    assert jnp.allclose(out2, ref2, atol=1e-5, rtol=1e-5), "mismatch vs reference (tiled)"
    assert jnp.allclose(jnp.sum(out2, axis=1), 1.0, atol=1e-5)

    # --- lane-major output path (no final transpose copy) ---
    out3 = jax.block_until_ready(
        qpredictor_forward(x2, params, block_batch=128, transpose_output=False))
    assert out3.shape == (out_features, 200)
    assert jnp.allclose(out3, ref2.T, atol=1e-5, rtol=1e-5), "mismatch (lane-major)"

    print("KERNEL_OK")
</pallas_src>

<mosaic_0001>
module attributes {stable_mosaic.version = 11 : i64} {
  func.func @qpredictor_kernel(%arg0: i32, %arg1: memref<128x16xf32, #tpu.memory_space<vmem>>, %arg2: memref<32x16xf32, #tpu.memory_space<vmem>>, %arg3: memref<32x1xf32, #tpu.memory_space<vmem>>, %arg4: memref<16x32xf32, #tpu.memory_space<vmem>>, %arg5: memref<16x1xf32, #tpu.memory_space<vmem>>, %arg6: memref<2x16xf32, #tpu.memory_space<vmem>>, %arg7: memref<2x1xf32, #tpu.memory_space<vmem>>, %arg8: memref<2x128xf32, #tpu.memory_space<vmem>>) attributes {dimension_semantics = [#tpu.dimension_semantics<parallel>], iteration_bounds = array<i64: 1>, scalar_prefetch = 0 : i64, scratch_operands = 0 : i64, tpu.core_type = #tpu.core_type<tc>, window_params = [{transform_indices = @transform_0, window_bounds = array<i64: 128, 16>}, {pipeline_mode = #tpu.pipeline_mode<synchronous>, transform_indices = @transform_1, window_bounds = array<i64: 32, 16>}, {pipeline_mode = #tpu.pipeline_mode<synchronous>, transform_indices = @transform_2, window_bounds = array<i64: 32, 1>}, {pipeline_mode = #tpu.pipeline_mode<synchronous>, transform_indices = @transform_3, window_bounds = array<i64: 16, 32>}, {pipeline_mode = #tpu.pipeline_mode<synchronous>, transform_indices = @transform_4, window_bounds = array<i64: 16, 1>}, {pipeline_mode = #tpu.pipeline_mode<synchronous>, transform_indices = @transform_5, window_bounds = array<i64: 2, 16>}, {pipeline_mode = #tpu.pipeline_mode<synchronous>, transform_indices = @transform_6, window_bounds = array<i64: 2, 1>}, {transform_indices = @transform_7, window_bounds = array<i64: 2, 128>}]} {
    %c0 = arith.constant 0 : index
    %c0_0 = arith.constant 0 : index
    %0 = vector.load %arg1[%c0, %c0_0] : memref<128x16xf32, #tpu.memory_space<vmem>>, vector<128x16xf32>
    %c0_1 = arith.constant 0 : index
    %c0_2 = arith.constant 0 : index
    %1 = vector.load %arg2[%c0_1, %c0_2] : memref<32x16xf32, #tpu.memory_space<vmem>>, vector<32x16xf32>
    %cst = arith.constant dense<0.000000e+00> : vector<32x128xf32>
    %2 = tpu.matmul %1, %0, %cst {dimension_numbers = #tpu.dot_dimension_numbers<[1], [1], [0], [0], [0, 0, 1, 0], [], []>} : vector<32x16xf32>, vector<128x16xf32>, vector<32x128xf32> -> vector<32x128xf32>
    %c0_3 = arith.constant 0 : index
    %c0_4 = arith.constant 0 : index
    %3 = vector.load %arg3[%c0_3, %c0_4] : memref<32x1xf32, #tpu.memory_space<vmem>>, vector<32x1xf32>
    %4 = vector.broadcast %3 : vector<32x1xf32> to vector<32x128xf32>
    %5 = arith.addf %2, %4 : vector<32x128xf32>
    %cst_5 = arith.constant 0.000000e+00 : f32
    %6 = vector.broadcast %cst_5 : f32 to vector<32x128xf32>
    %7 = arith.maximumf %5, %6 : vector<32x128xf32>
    %c0_6 = arith.constant 0 : index
    %c0_7 = arith.constant 0 : index
    %8 = vector.load %arg4[%c0_6, %c0_7] : memref<16x32xf32, #tpu.memory_space<vmem>>, vector<16x32xf32>
    %cst_8 = arith.constant dense<0.000000e+00> : vector<16x128xf32>
    %9 = tpu.matmul %8, %7, %cst_8 {dimension_numbers = #tpu.dot_dimension_numbers<[1], [0], [0], [1], [0, 0, 1, 1], [], []>} : vector<16x32xf32>, vector<32x128xf32>, vector<16x128xf32> -> vector<16x128xf32>
    %c0_9 = arith.constant 0 : index
    %c0_10 = arith.constant 0 : index
    %10 = vector.load %arg5[%c0_9, %c0_10] : memref<16x1xf32, #tpu.memory_space<vmem>>, vector<16x1xf32>
    %11 = vector.broadcast %10 : vector<16x1xf32> to vector<16x128xf32>
    %12 = arith.addf %9, %11 : vector<16x128xf32>
    %cst_11 = arith.constant 0.000000e+00 : f32
    %13 = vector.broadcast %cst_11 : f32 to vector<16x128xf32>
    %14 = arith.maximumf %12, %13 : vector<16x128xf32>
    %c0_12 = arith.constant 0 : index
    %c0_13 = arith.constant 0 : index
    %15 = vector.load %arg6[%c0_12, %c0_13] : memref<2x16xf32, #tpu.memory_space<vmem>>, vector<2x16xf32>
    %cst_14 = arith.constant dense<0.000000e+00> : vector<2x128xf32>
    %16 = tpu.matmul %15, %14, %cst_14 {dimension_numbers = #tpu.dot_dimension_numbers<[1], [0], [0], [1], [0, 0, 1, 1], [], []>} : vector<2x16xf32>, vector<16x128xf32>, vector<2x128xf32> -> vector<2x128xf32>
    %c0_15 = arith.constant 0 : index
    %c0_16 = arith.constant 0 : index
    %17 = vector.load %arg7[%c0_15, %c0_16] : memref<2x1xf32, #tpu.memory_space<vmem>>, vector<2x1xf32>
    %18 = vector.broadcast %17 : vector<2x1xf32> to vector<2x128xf32>
    %19 = arith.addf %16, %18 : vector<2x128xf32>
    %cst_17 = arith.constant dense<0xFF800000> : vector<128xf32>
    %20 = vector.multi_reduction <maximumf>, %19, %cst_17 [0] : vector<2x128xf32> to vector<128xf32>
    %21 = vector.shape_cast %20 : vector<128xf32> to vector<1x128xf32>
    %22 = vector.broadcast %21 : vector<1x128xf32> to vector<2x128xf32>
    %23 = arith.subf %19, %22 : vector<2x128xf32>
    %24 = math.exp %23 : vector<2x128xf32>
    %cst_18 = arith.constant dense<0.000000e+00> : vector<128xf32>
    %25 = vector.multi_reduction <add>, %24, %cst_18 [0] : vector<2x128xf32> to vector<128xf32>
    %26 = vector.shape_cast %25 : vector<128xf32> to vector<1x128xf32>
    %27 = tpu.reciprocal %26 : vector<1x128xf32> -> vector<1x128xf32>
    %28 = vector.broadcast %27 : vector<1x128xf32> to vector<2x128xf32>
    %29 = arith.mulf %24, %28 : vector<2x128xf32>
    %c0_19 = arith.constant 0 : index
    %c0_20 = arith.constant 0 : index
    %30 = vector.load %arg8[%c0_19, %c0_20] : memref<2x128xf32, #tpu.memory_space<vmem>>, vector<2x128xf32>
    tpu.vector_store %arg8[%c0_19, %c0_20], %29 {strides = array<i32>} : memref<2x128xf32, #tpu.memory_space<vmem>>, vector<2x128xf32>,
    return
  }
  func.func @transform_0(%arg0: i32) -> (i32, i32) {
    %c0_i32 = arith.constant 0 : i32
    %c0_i32_0 = arith.constant 0 : i32
    return %arg0, %c0_i32 : i32, i32
  }
  func.func @transform_1(%arg0: i32) -> (i32, i32) {
    %c0_i32 = arith.constant 0 : i32
    %c0_i32_0 = arith.constant 0 : i32
    %c0_i32_1 = arith.constant 0 : i32
    return %c0_i32, %c0_i32_0 : i32, i32
  }
  func.func @transform_2(%arg0: i32) -> (i32, i32) {
    %c0_i32 = arith.constant 0 : i32
    %c0_i32_0 = arith.constant 0 : i32
    %c0_i32_1 = arith.constant 0 : i32
    return %c0_i32, %c0_i32_0 : i32, i32
  }
  func.func @transform_3(%arg0: i32) -> (i32, i32) {
    %c0_i32 = arith.constant 0 : i32
    %c0_i32_0 = arith.constant 0 : i32
    %c0_i32_1 = arith.constant 0 : i32
    return %c0_i32, %c0_i32_0 : i32, i32
  }
  func.func @transform_4(%arg0: i32) -> (i32, i32) {
    %c0_i32 = arith.constant 0 : i32
    %c0_i32_0 = arith.constant 0 : i32
    %c0_i32_1 = arith.constant 0 : i32
    return %c0_i32, %c0_i32_0 : i32, i32
  }
  func.func @transform_5(%arg0: i32) -> (i32, i32) {
    %c0_i32 = arith.constant 0 : i32
    %c0_i32_0 = arith.constant 0 : i32
    %c0_i32_1 = arith.constant 0 : i32
    return %c0_i32, %c0_i32_0 : i32, i32
  }
  func.func @transform_6(%arg0: i32) -> (i32, i32) {
    %c0_i32 = arith.constant 0 : i32
    %c0_i32_0 = arith.constant 0 : i32
    %c0_i32_1 = arith.constant 0 : i32
    return %c0_i32, %c0_i32_0 : i32, i32
  }
  func.func @transform_7(%arg0: i32) -> (i32, i32) {
    %c0_i32 = arith.constant 0 : i32
    %c0_i32_0 = arith.constant 0 : i32
    return %c0_i32, %arg0 : i32, i32
  }
}

</mosaic_0001>

<bundles_post_ra>
// kernel: tpu_custom_call.1
= control target key start
LH: loop header
LB: loop body
LE: loop exit
PB: predicated region body
PF: predicated region fallthrough
CT: control target
= control target key end

     0   :  { %vm71_vm0 = vcmask 130048   ;;  %v636_v6 = vmov 0   ;;  %s828_s0 = inlined_call_operand.vmem [shape: f32[8,16], index: 0, kind: input, shape index: {}]   ;;  %s829_s1 = inlined_call_operand.vmem [shape: f32[32,16], index: 1, kind: input, shape index: {}]   ;;  %s830_s2 = inlined_call_operand.vmem [shape: f32[32,1], index: 2, kind: input, shape index: {}]   ;;  %s831_s3 = inlined_call_operand.vmem [shape: f32[16,32], index: 3, kind: input, shape index: {}]   ;;  %s832_s4 = inlined_call_operand.vmem [shape: f32[16,1], index: 4, kind: input, shape index: {}]   ;;  %s833_s5 = inlined_call_operand.vmem [shape: f32[2,16], index: 5, kind: input, shape index: {}]   ;;  %s834_s6 = inlined_call_operand.vmem [shape: f32[2,1], index: 6, kind: input, shape index: {}]   ;;  %s835_s7 = inlined_call_operand.hbm [shape: f32[2,128], index: 7, kind: output, shape index: {}]  }
   0x1   :  { %v27_v0 = vld [vmem:[%s828_s0] sm:$0xff]  ;;  %v28_v1 = vld [vmem:[%s828_s0 + $0x8] sm:$0xff]  ;;  %v29_v2 = vld [vmem:[%s828_s0 + $0x10] sm:$0xff]  ;;  %606 = vset.pattern.permute.xlu0 %v636_v6  ;;  %607 = vset.pattern.permute.xlu1 %v636_v6 }
   0x2   :  { %v542_v3 = vpack.c.bf16 %v28_v1, %v27_v0  ;;  %vm692_vm1 = vmpackc.low %vm71_vm0, %vm71_vm0  ;;  %v30_v5 = vld [vmem:[%s828_s0 + $0x18] sm:$0xff]  ;;  %v43_v8 = vld [vmem:[%s829_s1] sm:$0xff] }
   0x3   :  { %v548_v7 = vpack.c.bf16 %v30_v5, %v29_v2  ;;  %v31_v9 = vld [vmem:[%s828_s0 + $0x20] sm:$0xff]  ;;  %v32_v10 = vld [vmem:[%s828_s0 + $0x28] sm:$0xff]  ;;  %518 = vmatprep.mubr.msk.f32.mxu0 %vm71_vm0, %v43_v8  ;;  %v49_v12 = vld [vmem:[%s830_s2 + $0x10] sm:$0xff] }
   0x4   :  { %544 = vmatprep.subr.msk.bf16.mxu0 %vm692_vm1, %v542_v3  ;;  %v47_v11 = vld [vmem:[%s830_s2] sm:$0xff]  ;;  %63 = vperm.xlu1 %607, %v49_v12   ;;  %v554_v13 = vpack.c.bf16 %v32_v10, %v31_v9  ;;  %v48_v14 = vld [vmem:[%s830_s2 + $0x8] sm:$0xff] }
   0x5   :  { %547 = vmatpush3.bf16.xpose.msk.msra.mxu0 %vm692_vm1, %v542_v3  ;;  %53 = vperm.xlu0 %606, %v47_v11  }
   0x6   :  { %550 = vmatprep.subr.msk.bf16.mxu0 %vm692_vm1, %v548_v7 }
   0x7   :  { %12 = vsyncpa [#allocation3], 0  ;;  %v50_v15 = vld [vmem:[%s830_s2 + $0x18] sm:$0xff]  ;;  %v223_v16 = vld [vmem:[%s832_s4] sm:$0xff]  ;;  %vm235_vm2 = vcmask 261120   ;;  %v637_v57 = vmov 0.0|0.0  }
   0x8   :  { %68 = vperm.xlu1 %607, %v50_v15   ;;  %v33_v17 = vld [vmem:[%s828_s0 + $0x30] sm:$0xff]  ;;  %v34_v18 = vld [vmem:[%s828_s0 + $0x38] sm:$0xff]  ;;  %v224_v19 = vld [vmem:[%s832_s4 + $0x8] sm:$0xff]  ;;  %vm638_vm3 = vmmov 0   ;;  %v639_v58 = vmov 0.0   ;;  %vm399_vm4 = vcmask 1041408  }
   0x9   :  { %58 = vperm.xlu0 %606, %v48_v14   ;;  %v560_v20 = vpack.c.bf16 %v34_v18, %v33_v17  ;;  %v320_v21 = vld [vmem:[%s834_s6] sm:$0x3]  ;;  %v36_v23 = vld [vmem:[%s828_s0 + $0x48] sm:$0xff]  ;;  %v37_v25 = vld [vmem:[%s828_s0 + $0x50] sm:$0xff] }
   0xa   :  { %v35_v22 = vld [vmem:[%s828_s0 + $0x40] sm:$0xff]  ;;  %v38_v26 = vld [vmem:[%s828_s0 + $0x58] sm:$0xff]  ;;  %v40_v29 = vld [vmem:[%s828_s0 + $0x68] sm:$0xff] }
   0xb   :  { %v566_v24 = vpack.c.bf16 %v36_v23, %v35_v22  ;;  %v572_v27 = vpack.c.bf16 %v38_v26, %v37_v25  ;;  %v39_v28 = vld [vmem:[%s828_s0 + $0x60] sm:$0xff]  ;;  %v41_v31 = vld [vmem:[%s828_s0 + $0x70] sm:$0xff]  ;;  %v42_v32 = vld [vmem:[%s828_s0 + $0x78] sm:$0xff] }
   0xc   :  { %232 = vperm.xlu1 %607, %v224_v19   ;;  %v578_v30 = vpack.c.bf16 %v40_v29, %v39_v28  ;;  %v584_v33 = vpack.c.bf16 %v42_v32, %v41_v31  ;;  %v44_v34 = vld [vmem:[%s829_s1 + $0x8] sm:$0xff]  ;;  %v45_v35 = vld [vmem:[%s829_s1 + $0x10] sm:$0xff]  ;;  %v46_v36 = vld [vmem:[%s829_s1 + $0x18] sm:$0xff] }
   0xd   :  { %553 = vmatpush3.bf16.xpose.msk.msra.mxu0 %vm692_vm1, %v548_v7  ;;  %227 = vperm.xlu0 %606, %v223_v16   ;;  %v221_v37 = vld [vmem:[%s831_s3] sm:$0xff]  ;;  %v222_v56 = vld [vmem:[%s831_s3 + $0x8] sm:$0xff]  ;;  %s640_s3 = smov [#allocation2]  }
   0xe   :  { %556 = vmatprep.subr.msk.bf16.mxu0 %vm692_vm1, %v554_v13  ;;  %532 = vmatprep.mubr.msk.f32.mxu1 %vm235_vm2, %v221_v37  ;;  %v319_v4 = vld [vmem:[%s833_s5] sm:$0x3]  ;;  %s426_s5 = sshll.u32 %s640_s3, 4  ;;  %s427_s5 = int_to_ptr.vmem [resolvable:$true] %s426_s5 }
   0xf   :  { %s612_s9 = scalar_lea.vmem %s427_s5, 32  ;;  %p617_p1 = scmp.lt.s32.totalorder %s427_s5, %s427_s5 }
  0x10   :  { %p613_p0 = scmp.ne.s32.totalorder %s427_s5, %s612_s9  ;;  %p618_p2 = scmp.lt.s32.totalorder %s612_s9, %s612_s9 }
  0x11   :  { %323 = vperm.xlu0 %606, %v320_v21  }
  0x12   :  { %p619_p3 = por %p618_p2, %p617_p1 }
  0x14   :  { %p620_p4 = pnand %p619_p3, %p613_p0 }
  0x15   :  { %559 = vmatpush3.bf16.xpose.msk.msra.mxu0 %vm692_vm1, %v554_v13 }
  0x16   :  { %562 = vmatprep.subr.msk.bf16.mxu0 %vm692_vm1, %v560_v20 }
  0x1d   :  { %565 = vmatpush3.bf16.xpose.msk.msra.mxu0 %vm692_vm1, %v560_v20 }
  0x1e   :  { %568 = vmatprep.subr.msk.bf16.mxu0 %vm692_vm1, %v566_v24 }
  0x25   :  { %571 = vmatpush3.bf16.xpose.msk.msra.mxu0 %vm692_vm1, %v566_v24 }
  0x26   :  { %574 = vmatprep.subr.msk.bf16.mxu0 %vm692_vm1, %v572_v27 }
  0x2d   :  { %577 = vmatpush3.bf16.xpose.msk.msra.mxu0 %vm692_vm1, %v572_v27 }
  0x2e   :  { %580 = vmatprep.subr.msk.bf16.mxu0 %vm692_vm1, %v578_v30 }
  0x35   :  { %583 = vmatpush3.bf16.xpose.msk.msra.mxu0 %vm692_vm1, %v578_v30 }
  0x36   :  { %586 = vmatprep.subr.msk.bf16.mxu0 %vm692_vm1, %v584_v33 }
  0x3d   :  { %589 = vmatpush3.bf16.xpose.msk.msra.mxu0 %vm692_vm1, %v584_v33 }
  0x44   :  { %519 = vmatmul.mubr.msk.f32.vlgmr.msra.gmra.mrb[0].mxu0 %vm71_vm0, %v44_v34 }
  0x45   :  { %521 = vmatprep.mubr.msk.f32.mxu0 %vm71_vm0, %v45_v35 }
  0x48   :  { %522 = vmatmul.mubr.msk.f32.gmra.mrb[2].mxu0 %vm71_vm0, %v46_v36 }
  0x83   :  { %v64_v39 = vpop.permute.xlu1 %63 }
  0x84   :  { %v54_v38 = vpop.permute.xlu0 %53 }
  0x87   :  { %v69_v46 = vpop.permute.xlu1 %68 }
  0x88   :  { %v59_v40 = vpop.permute.xlu0 %58 }
  0x8b   :  { %v233_v59 = vpop.permute.xlu1 %232 }
  0x8c   :  { %v228_v61 = vpop.permute.xlu0 %227 }
  0x90   :  { %v324_v5 = vpop.permute.xlu0 %323 }
 0x117   :  { %v520_v41 = vpop.f32.mrb[0].mxu0 }
 0x118   :  { %v204_v42 = vadd.f32 %v520_v41, %v59_v40  ;;  %v198_v43 = vpop.f32.mrb[1].mxu0 }
 0x119   :  { %v199_v44 = vadd.f32 %v198_v43, %v54_v38 }
 0x11a   :  { %v218_v45 = vmax.f32 %v204_v42, 0.0 }
 0x11b   :  { %v217_v47 = vmax.f32 %v199_v44, 0.0  ;;  %v523_v48 = vpop.f32.mrb[2].mxu0 }
 0x11c   :  { %v214_v49 = vadd.f32 %v523_v48, %v69_v46  ;;  %v208_v50 = vpop.f32.mrb[3].mxu0 }
 0x11d   :  { %v209_v51 = vadd.f32 %v208_v50, %v64_v39  ;;  %v590_v52 = vpack.c.bf16 %v218_v45, %v217_v47 }
 0x11e   :  { %v220_v53 = vmax.f32 %v214_v49, 0.0 }
 0x11f   :  { %v219_v54 = vmax.f32 %v209_v51, 0.0  ;;  %591 = vmatprep.subr.bf16.mxu1 %v590_v52 }
 0x120   :  { %593 = vmatpush3.bf16.msra.mxu1 %v590_v52 }
 0x121   :  { %v594_v55 = vpack.c.bf16 %v220_v53, %v219_v54 }
 0x123   :  { %595 = vmatprep.subr.bf16.mxu1 %v594_v55 }
 0x124   :  { %597 = vmatpush3.bf16.msra.mxu1 %v594_v55 }
 0x125   :  { %598 = vmatprep.subr.bf16.mxu1 %v637_v57 }
 0x127   :  { %533 = vmatmul.mubr.msk.f32.vlgmr.msra.gmra.mrb[0].mxu1 %vm235_vm2, %v222_v56 }
 0x128   :  { %539 = vmatprep.mubr.msk.f32.mxu1 %vm638_vm3, %v639_v58 }
 0x1fa   :  { %v534_v60 = vpop.f32.mrb[0].mxu1 }
 0x1fb   :  { %v314_v62 = vadd.f32 %v534_v60, %v233_v59  ;;  %v308_v63 = vpop.f32.mrb[1].mxu1 }
 0x1fc   :  { %v309_v0 = vadd.f32 %v308_v63, %v228_v61 }
 0x1fd   :  { %v318_v1 = vmax.f32 %v314_v62, 0.0 }
 0x1fe   :  { %v317_v2 = vmax.f32 %v309_v0, 0.0 }
 0x200   :  { %v599_v3 = vpack.c.bf16 %v318_v1, %v317_v2 }
 0x202   :  { %600 = vmatpush3.bf16.msra.mxu1 %v599_v3 }
 0x205   :  { %540 = vmatmul.mubr.msk.f32.vlgmr.msra.gmra.mrb[2].mxu1 %vm71_vm0, %v319_v4 }
 0x2d8   :  { %v395_v6 = vpop.f32.mrb[2].mxu1 }
 0x2d9   :  { %v396_v7 = vadd.f32 %v395_v6, %v324_v5  ;;  %v541_v8 = vpop.f32.mrb[3].mxu1 }
 0x2db   :  { %v400_v9 = vsel %vm399_vm4, %v396_v7, -inf }
 0x2dc   :  { %v401_v10 = vrot.slane %v400_v9, 4 }
 0x2de   :  { %v402_v11 = vmax.f32 %v400_v9, %v401_v10 }
 0x2e0   :  { %v403_v12 = vrot.slane %v402_v11, 2 }
 0x2e2   :  { %v404_v13 = vmax.f32 %v402_v11, %v403_v12 }
 0x2e4   :  { %v405_v14 = vrot.slane %v404_v13, 1 }
 0x2e6   :  { %v406_v15 = vmax.f32 %v404_v13, %v405_v14 }
 0x2e8   :  { %v407_v16 = vsub.f32 %v396_v7, %v406_v15 }
 0x2ea   :  { %v408_v17 = vmul.f32 1.442695, %v407_v16 }
 0x2ec   :  { %608 = vpow2.f32 %v408_v17 }
 0x2f6   :  { %v609_v18 = vpop.eup %608 }
 0x2f7   :  { %v410_v19 = vsel %vm399_vm4, %v609_v18, 0.0 }
 0x2f8   :  { %v411_v20 = vrot.slane %v410_v19, 4 }
 0x2fa   :  { %v412_v21 = vadd.f32 %v411_v20, %v410_v19 }
 0x2fc   :  { %v413_v22 = vrot.slane %v412_v21, 2 }
 0x2fe   :  { %v414_v23 = vadd.f32 %v413_v22, %v412_v21 }
 0x300   :  { %v415_v24 = vrot.slane %v414_v23, 1 }
 0x302   :  { %v416_v25 = vadd.f32 %v415_v24, %v414_v23 }
 0x304   :  { %610 = vrcp.f32 %v416_v25 }
 0x30e   :  { %v611_v26 = vpop.eup %610 }
 0x30f   :  { %v418_v27 = vmul.f32 %v611_v26, %v609_v18 }
 0x311   :  { %419 = vst [vmem:[#allocation2] sm:$0x3] %v418_v27 }
 0x312   :  { %623 = shalt.err (!%p620_p4)
}
 0x313   :  { %s624_s4 = scalar_lea.hbm %s835_s7, 32 }
 0x314   :  { %p625_p5 = scmp.ne.s32.totalorder %s835_s7, %s624_s4  ;;  %p628_p6 = scmp.lt.u32.totalorder %s624_s4, %s835_s7 }
 0x316   :  { %p630_p7 = pnand %p628_p6, %p625_p5 }
 0x318   :  { %633 = shalt.err (!%p630_p7)
}
 0x319   :  { %429 = dma.vmem_to_hbm [thread:$0]  %s427_s5, 32, %s835_s7, [#allocation3]  }
 0x31a   :  { %634 = dma.done.wait [#allocation3], 32  }
 0x31b   :  { %635 = vsyncadd [#allocation3], 4294967264 }
 0x31c   :  { %433 = vsyncpa [#allocation3], 1 }

</bundles_post_ra>
